<compile_context>
chip_gen: v7x
topology: tpu7x:2x2x1
jax: 0.10.0
libtpu: 0.0.40
codegen_flags: <defaults>
</compile_context>

<pallas_src>
import functools

import jax
import jax.numpy as jnp
from jax.experimental import pallas as pl
from jax.experimental.pallas import tpu as pltpu

_LANES = 128


def _default_vmem_limit():
    # Generation-aware scoped-VMEM budget: leave headroom under physical VMEM
    # (64 MiB on v7x, 128 MiB on v5e/v6e) but sit above the conservative scoped
    # defaults so large tiles keep double-buffering.
    try:
        phys = int(pltpu.get_tpu_info().vmem_capacity_bytes)
    except Exception:
        phys = 64 * 1024 * 1024
    return max(32 * 1024 * 1024, min(phys - 16 * 1024 * 1024, 96 * 1024 * 1024))


_VMEM_LIMIT = _default_vmem_limit()
# Bigger HW tiles on the 128-MiB-VMEM generations, 512 on v7x.
_HW_CAP = 1024 if _VMEM_LIMIT >= 80 * 1024 * 1024 else 512


def _round_up(n, m):
    return ((n + m - 1) // m) * m


# ----------------------------------------------------------------------------
# 1. feat_map: encoded_text = bert_hidden @ W + b, emitted directly as the
#    zero-padded bf16 (B, max_text_len, D) slab the fused head consumes.
# ----------------------------------------------------------------------------
def _featmap_kernel(x_ref, w_ref, b_ref, o_ref):
    y = (
        jnp.dot(x_ref[0], w_ref[...], preferred_element_type=jnp.float32)
        + b_ref[...]
    )                                                       # (LT, D) f32
    lt, d = y.shape
    max_t = o_ref.shape[1]
    if max_t > lt:                                          # static pad to max_text_len
        y = jnp.concatenate([y, jnp.zeros((max_t - lt, d), jnp.float32)], axis=0)
    o_ref[0] = y.astype(o_ref.dtype)


def feat_map_pallas(bert_hidden, w, b, max_text_len):
    B, LT, HB = bert_hidden.shape
    _, D = w.shape
    if LT > max_text_len:                                   # module truncates to max_text_len
        bert_hidden = bert_hidden[:, :max_text_len, :]
        LT = max_text_len
    return pl.pallas_call(
        _featmap_kernel,
        out_shape=jax.ShapeDtypeStruct((B, max_text_len, D), jnp.bfloat16),
        grid=(B,),
        in_specs=[
            pl.BlockSpec((1, LT, HB), lambda b_: (b_, 0, 0)),
            pl.BlockSpec((HB, D), lambda b_: (0, 0)),
            pl.BlockSpec((1, D), lambda b_: (0, 0)),
        ],
        out_specs=pl.BlockSpec((1, max_text_len, D), lambda b_: (b_, 0, 0)),
        compiler_params=pltpu.CompilerParams(
            dimension_semantics=("parallel",),
            vmem_limit_bytes=_VMEM_LIMIT,
        ),
    )(
        bert_hidden.astype(jnp.bfloat16),
        w.astype(jnp.bfloat16),
        b.reshape(1, D).astype(jnp.float32),
    )


# ----------------------------------------------------------------------------
# 2. input_proj: 1x1 Conv2d (channel matmul) + GroupNorm(32, hidden_dim)
#    Pass 1 (stats): conv computed ONCE per tile, unnormalized output y written
#      in bf16, per-channel sum / sum-of-squares accumulated in a resident
#      (1,2,D) block; at the last HW tile reduced to per-group mean / rstd.
#    Pass 2 (apply): reads y + stats only and normalizes (no conv recompute,
#      no second read of the Cin-wide source).
# ----------------------------------------------------------------------------
def _gn_stats_kernel(x_ref, w_ref, b_ref, ga_ref, y_ref, stat_ref, *,
                     inv_n, t_hw, hw_real):
    t = pl.program_id(1)

    @pl.when(t == 0)
    def _():
        stat_ref[...] = jnp.zeros_like(stat_ref)

    y = (
        jnp.dot(x_ref[0], w_ref[...], preferred_element_type=jnp.float32)
        + b_ref[...]
    )                                                               # (t_hw, D) f32
    y_ref[0] = y.astype(y_ref.dtype)

    if hw_real is not None:
        # HW was zero-padded: padded rows produce y == bias, mask them out of
        # the statistics (inv_n already uses the real HW).
        row0 = t * t_hw
        rid = jax.lax.broadcasted_iota(jnp.int32, (t_hw, 1), 0) + row0
        ym = jnp.where(rid < hw_real, y, 0.0)
    else:
        ym = y

    stat_ref[0, 0:1, :] += jnp.sum(ym, axis=0, keepdims=True)
    stat_ref[0, 1:2, :] += jnp.sum(ym * ym, axis=0, keepdims=True)

    @pl.when(t == pl.num_programs(1) - 1)
    def _():
        chan_sum = stat_ref[0, 0:1, :]                              # (1, D)
        chan_ssq = stat_ref[0, 1:2, :]
        grp_mean = (
            jnp.dot(chan_sum, ga_ref[...], preferred_element_type=jnp.float32)
            * inv_n
        )
        grp_msq = (
            jnp.dot(chan_ssq, ga_ref[...], preferred_element_type=jnp.float32)
            * inv_n
        )
        # f32 accumulation + clamp: guards against tiny negative E[x^2]-E[x]^2.
        var = jnp.maximum(grp_msq - grp_mean * grp_mean, 0.0)
        stat_ref[0, 0:1, :] = grp_mean
        stat_ref[0, 1:2, :] = jax.lax.rsqrt(var + 1e-5)


def _gn_apply_kernel(y_ref, stat_ref, gamma_ref, beta_ref, o_ref):
    y = y_ref[0].astype(jnp.float32)
    mean = stat_ref[0, 0:1, :]
    rstd = stat_ref[0, 1:2, :]
    o_ref[0] = (y - mean) * rstd * gamma_ref[...] + beta_ref[...]


def input_proj_pallas(src_cl, w, b, gamma, beta, grp_avg, hw_cap=None):
    B, HW, Cin = src_cl.shape
    _, D = w.shape
    if hw_cap is None:
        hw_cap = _HW_CAP

    t_hw = min(hw_cap, _round_up(HW, 8))
    hw_pad = _round_up(HW, t_hw)
    n_t = hw_pad // t_hw
    needs_pad = hw_pad != HW

    x = src_cl
    if needs_pad:
        x = jnp.pad(x, ((0, 0), (0, hw_pad - HW), (0, 0)))
    x_bf = x.astype(jnp.bfloat16)
    w_bf = w.astype(jnp.bfloat16)
    b2 = b.reshape(1, D).astype(jnp.float32)

    stats_kernel = functools.partial(
        _gn_stats_kernel, inv_n=1.0 / HW, t_hw=t_hw,
        hw_real=HW if needs_pad else None)

    y_bf, stats = pl.pallas_call(
        stats_kernel,
        out_shape=(
            jax.ShapeDtypeStruct((B, hw_pad, D), jnp.bfloat16),     # unnormalized conv out
            jax.ShapeDtypeStruct((B, 2, D), jnp.float32),           # (mean, rstd) per channel
        ),
        grid=(B, n_t),
        in_specs=[
            pl.BlockSpec((1, t_hw, Cin), lambda b_, t: (b_, t, 0)),
            pl.BlockSpec((Cin, D), lambda b_, t: (0, 0)),
            pl.BlockSpec((1, D), lambda b_, t: (0, 0)),
            pl.BlockSpec((D, D), lambda b_, t: (0, 0)),
        ],
        out_specs=(
            pl.BlockSpec((1, t_hw, D), lambda b_, t: (b_, t, 0)),
            pl.BlockSpec((1, 2, D), lambda b_, t: (b_, 0, 0)),
        ),
        compiler_params=pltpu.CompilerParams(
            dimension_semantics=("parallel", "arbitrary"),
            vmem_limit_bytes=_VMEM_LIMIT,
        ),
    )(x_bf, w_bf, b2, grp_avg.astype(jnp.float32))

    out = pl.pallas_call(
        _gn_apply_kernel,
        out_shape=jax.ShapeDtypeStruct((B, hw_pad, D), jnp.float32),
        grid=(B, n_t),
        in_specs=[
            pl.BlockSpec((1, t_hw, D), lambda b_, t: (b_, t, 0)),
            pl.BlockSpec((1, 2, D), lambda b_, t: (b_, 0, 0)),
            pl.BlockSpec((1, D), lambda b_, t: (0, 0)),
            pl.BlockSpec((1, D), lambda b_, t: (0, 0)),
        ],
        out_specs=pl.BlockSpec((1, t_hw, D), lambda b_, t: (b_, t, 0)),
        compiler_params=pltpu.CompilerParams(
            dimension_semantics=("parallel", "parallel"),
            vmem_limit_bytes=_VMEM_LIMIT,
        ),
    )(
        y_bf,
        stats,
        gamma.reshape(1, D).astype(jnp.float32),
        beta.reshape(1, D).astype(jnp.float32),
    )

    if needs_pad:
        out = out[:, :HW, :]
    return out


# ----------------------------------------------------------------------------
# 3+4. Fused decoder head: bbox MLP + ContrastiveEmbed over a (B, L) grid.
#      hs is read once per (b, l); the (maxT, D) text block and mask depend only
#      on b so they stay VMEM-resident across the inner L axis; both grid axes
#      are parallel (independent outputs) so v7x megacore is used at B=1.
#      reference enters at its native 4-lane width, box leaves at 4 lanes f32,
#      cls logits leave in bf16.
# ----------------------------------------------------------------------------
def _head_kernel(hs_ref, ref_ref, txt_ref, mask_ref,
                 w1_ref, b1_ref, w2_ref, b2_ref, w3_ref, b3_ref,
                 cls_ref, box_ref):
    x = hs_ref[0, 0]                                                 # (Q, D) bf16

    # --- ContrastiveEmbed: hs @ encoded_text^T (trans-B matmul, no pre-transpose)
    logits = jax.lax.dot_general(
        x, txt_ref[0], (((1,), (1,)), ((), ())),
        preferred_element_type=jnp.float32)                          # (Q, maxT)
    cls_ref[0, 0] = jnp.where(mask_ref[0] > 0.5, logits, -jnp.inf).astype(cls_ref.dtype)

    # --- bbox MLP (3 layers, ReLU), bf16 matmuls / f32 accumulation+epilogue
    h = jnp.maximum(
        jnp.dot(x, w1_ref[...], preferred_element_type=jnp.float32) + b1_ref[...],
        0.0,
    )
    h = jnp.maximum(
        jnp.dot(h.astype(jnp.bfloat16), w2_ref[...],
                preferred_element_type=jnp.float32) + b2_ref[...],
        0.0,
    )
    delta = (
        jnp.dot(h.astype(jnp.bfloat16), w3_ref[...],
                preferred_element_type=jnp.float32) + b3_ref[...]
    )                                                                # (Q, 128), 4 real cols

    # inverse_sigmoid(reference) with eps=1e-3, computed on the native (Q, 4) slab
    r = jnp.clip(ref_ref[0, 0], 0.0, 1.0)                            # (Q, 4)
    inv_sig = jnp.log(jnp.maximum(r, 1e-3) / jnp.maximum(1.0 - r, 1e-3))
    box_ref[0, 0] = jax.nn.sigmoid(delta[:, :4] + inv_sig)


def heads_pallas(hs, reference, encoded_text_pad, text_mask_pad,
                 w1, b1, w2, b2, w3, b3):
    L, B, Q, D = hs.shape
    maxT = encoded_text_pad.shape[1]

    # bbox head last layer padded to a lane-dense 128-wide weight (resident, cheap)
    w3p = jnp.zeros((D, _LANES), jnp.float32).at[:, :4].set(w3)
    b3p = jnp.zeros((1, _LANES), jnp.float32).at[0, :4].set(b3)

    cls, box = pl.pallas_call(
        _head_kernel,
        out_shape=(
            jax.ShapeDtypeStruct((L, B, Q, maxT), jnp.bfloat16),
            jax.ShapeDtypeStruct((L, B, Q, 4), jnp.float32),
        ),
        grid=(B, L),
        in_specs=[
            pl.BlockSpec((1, 1, Q, D), lambda b_, l: (l, b_, 0, 0)),
            pl.BlockSpec((1, 1, Q, 4), lambda b_, l: (l, b_, 0, 0)),
            pl.BlockSpec((1, maxT, D), lambda b_, l: (b_, 0, 0)),
            pl.BlockSpec((1, 1, maxT), lambda b_, l: (b_, 0, 0)),
            pl.BlockSpec((D, D), lambda b_, l: (0, 0)),
            pl.BlockSpec((1, D), lambda b_, l: (0, 0)),
            pl.BlockSpec((D, D), lambda b_, l: (0, 0)),
            pl.BlockSpec((1, D), lambda b_, l: (0, 0)),
            pl.BlockSpec((D, _LANES), lambda b_, l: (0, 0)),
            pl.BlockSpec((1, _LANES), lambda b_, l: (0, 0)),
        ],
        out_specs=(
            pl.BlockSpec((1, 1, Q, maxT), lambda b_, l: (l, b_, 0, 0)),
            pl.BlockSpec((1, 1, Q, 4), lambda b_, l: (l, b_, 0, 0)),
        ),
        compiler_params=pltpu.CompilerParams(
            dimension_semantics=("parallel", "parallel"),
            vmem_limit_bytes=_VMEM_LIMIT,
        ),
    )(
        hs.astype(jnp.bfloat16),
        reference.astype(jnp.float32),
        encoded_text_pad,
        text_mask_pad,
        w1.astype(jnp.bfloat16),
        b1.reshape(1, D).astype(jnp.float32),
        w2.astype(jnp.bfloat16),
        b2.reshape(1, D).astype(jnp.float32),
        w3p.astype(jnp.bfloat16),
        b3p,
    )
    return cls, box


# ----------------------------------------------------------------------------
if __name__ == "__main__":
    key = jax.random.PRNGKey(0)
    ks = jax.random.split(key, 10)
    f32 = jnp.float32

    B, Cin, H, W = 2, 4, 16, 16
    HW = H * W
    D = 32        # transformer.d_model / hidden_dim
    HB = 32       # BERT hidden size
    LT = 8        # tokenized caption length
    MAXT = 128    # max_text_len (scaled down from 256, kept lane-dense)
    Q = 8         # num_queries
    LDEC = 2      # transformer.num_decoder_layers
    G = 32        # GroupNorm num_groups (as in the module)

    # ---- synthetic outputs of external sub-modules --------------------------
    # TODO(synk): BERT / backbone / deformable transformer / tokenizer are external modules.
    bert_last_hidden = jax.random.normal(ks[0], (B, LT, HB), f32)
    text_token_mask = jnp.array(
        [[1, 1, 1, 1, 1, 1, 0, 0], [1, 1, 1, 1, 1, 1, 1, 1]], f32
    )                                                         # (B, LT) valid-token mask
    backbone_feat = jax.random.normal(ks[1], (B, Cin, H, W), f32)    # NCHW backbone output
    hs = 0.1 * jax.random.normal(ks[2], (LDEC, B, Q, D), f32)        # decoder hidden states
    reference = jax.nn.sigmoid(jax.random.normal(ks[3], (LDEC + 1, B, Q, 4), f32))

    # ---- parameters (deterministic, following the module's __init__) --------
    lim_fm = (6.0 / (HB + D)) ** 0.5
    w_featmap = jax.random.uniform(ks[4], (HB, D), f32, -lim_fm, lim_fm)  # xavier_uniform
    b_featmap = jnp.zeros((D,), f32)                                      # constant_(0)

    lim_cv = (6.0 / (Cin + D)) ** 0.5
    w_conv = jax.random.uniform(ks[5], (Cin, D), f32, -lim_cv, lim_cv)    # 1x1 conv, xavier
    b_conv = jnp.zeros((D,), f32)
    gn_gamma = jnp.ones((D,), f32)
    gn_beta = jnp.zeros((D,), f32)
    Cg = D // G
    grp_id = jnp.arange(D) // Cg
    gn_avg = (grp_id[:, None] == grp_id[None, :]).astype(f32) / Cg        # group-average matrix

    lim_mlp = (6.0 / (D + D)) ** 0.5
    w1 = jax.random.uniform(ks[6], (D, D), f32, -lim_mlp, lim_mlp)
    b1 = jnp.zeros((D,), f32)
    w2 = jax.random.uniform(ks[7], (D, D), f32, -lim_mlp, lim_mlp)
    b2 = jnp.zeros((D,), f32)
    w3 = jnp.zeros((D, 4), f32)   # last bbox layer zero-init per module __init__
    b3 = jnp.zeros((4,), f32)

    # ---- forward -------------------------------------------------------------
    # 1. encoded_text = feat_map(bert_output['last_hidden_state']), emitted directly
    #    in the padded bf16 (B, max_text_len, D) layout consumed by the head.
    encoded_text_pad = feat_map_pallas(bert_last_hidden, w_featmap, b_featmap, MAXT)
    text_mask_pad = jnp.zeros((B, 1, MAXT), f32).at[:, 0, :LT].set(text_token_mask)

    # 2. srcs[l] = GroupNorm(Conv1x1(backbone feature))      (channel-last layout)
    src_cl = jnp.transpose(backbone_feat, (0, 2, 3, 1)).reshape(B, HW, Cin)
    src_proj = input_proj_pallas(src_cl, w_conv, b_conv, gn_gamma, gn_beta, gn_avg)

    # 3+4. fused head: outputs_coord = sigmoid(bbox_embed(hs)+inv_sigmoid(ref[:-1]))
    #                  outputs_class = ContrastiveEmbed(hs, text_dict) padded to max_text_len
    outputs_class, outputs_coord = heads_pallas(
        hs, reference[:-1], encoded_text_pad, text_mask_pad,
        w1, b1, w2, b2, w3, b3,
    )

    out = {
        "pred_logits": outputs_class[-1],     # (B, Q, max_text_len), bf16
        "pred_boxes": outputs_coord[-1],      # (B, Q, 4), f32
        "srcs": src_proj,                     # projected backbone features (B, H*W, D)
        "dn_meta": None,  # TODO(synk): prepare_for_cdn (training-time denoising queries) omitted
    }

    jax.block_until_ready((out["pred_logits"], out["pred_boxes"], out["srcs"]))
    print("KERNEL_OK")
</pallas_src>

<mosaic_0001>
module attributes {stable_mosaic.version = 11 : i64} {
  func.func @_featmap_kernel(%arg0: i32, %arg1: memref<1x8x32xbf16, #tpu.memory_space<vmem>>, %arg2: memref<32x32xbf16, #tpu.memory_space<vmem>>, %arg3: memref<1x32xf32, #tpu.memory_space<vmem>>, %arg4: memref<1x128x32xbf16, #tpu.memory_space<vmem>>) attributes {dimension_semantics = [#tpu.dimension_semantics<parallel>], iteration_bounds = array<i64: 2>, scalar_prefetch = 0 : i64, scratch_operands = 0 : i64, tpu.core_type = #tpu.core_type<tc>, window_params = [{transform_indices = @transform_0, window_bounds = array<i64: 1, 8, 32>}, {pipeline_mode = #tpu.pipeline_mode<synchronous>, transform_indices = @transform_1, window_bounds = array<i64: 32, 32>}, {pipeline_mode = #tpu.pipeline_mode<synchronous>, transform_indices = @transform_2, window_bounds = array<i64: 1, 32>}, {transform_indices = @transform_3, window_bounds = array<i64: 1, 128, 32>}]} {
    %c0 = arith.constant 0 : index
    %c0_0 = arith.constant 0 : index
    %c0_1 = arith.constant 0 : index
    %0 = vector.load %arg1[%c0, %c0_0, %c0_1] : memref<1x8x32xbf16, #tpu.memory_space<vmem>>, vector<1x8x32xbf16>
    %1 = vector.shape_cast %0 : vector<1x8x32xbf16> to vector<8x32xbf16>
    %c0_2 = arith.constant 0 : index
    %c0_3 = arith.constant 0 : index
    %2 = vector.load %arg2[%c0_2, %c0_3] : memref<32x32xbf16, #tpu.memory_space<vmem>>, vector<32x32xbf16>
    %cst = arith.constant dense<0.000000e+00> : vector<8x32xf32>
    %3 = tpu.matmul %1, %2, %cst {dimension_numbers = #tpu.dot_dimension_numbers<[1], [0], [0], [1], [0, 0, 1, 1], [], []>} : vector<8x32xbf16>, vector<32x32xbf16>, vector<8x32xf32> -> vector<8x32xf32>
    %c0_4 = arith.constant 0 : index
    %c0_5 = arith.constant 0 : index
    %4 = vector.load %arg3[%c0_4, %c0_5] : memref<1x32xf32, #tpu.memory_space<vmem>>, vector<1x32xf32>
    %5 = vector.broadcast %4 : vector<1x32xf32> to vector<8x32xf32>
    %6 = arith.addf %3, %5 : vector<8x32xf32>
    %cst_6 = arith.constant 0.000000e+00 : f32
    %7 = vector.broadcast %cst_6 : f32 to vector<120x32xf32>
    %8 = tpu.concatenate %6, %7 in 0 : vector<8x32xf32>, vector<120x32xf32> -> vector<128x32xf32>
    %9 = arith.truncf %8 : vector<128x32xf32> to vector<128x32xbf16>
    %c0_7 = arith.constant 0 : index
    %c0_8 = arith.constant 0 : index
    %c0_9 = arith.constant 0 : index
    %10 = vector.load %arg4[%c0_7, %c0_8, %c0_9] : memref<1x128x32xbf16, #tpu.memory_space<vmem>>, vector<1x128x32xbf16>
    %11 = vector.shape_cast %10 : vector<1x128x32xbf16> to vector<128x32xbf16>
    %12 = vector.shape_cast %9 : vector<128x32xbf16> to vector<1x128x32xbf16>
    tpu.vector_store %arg4[%c0_7, %c0_8, %c0_9], %12 {strides = array<i32>} : memref<1x128x32xbf16, #tpu.memory_space<vmem>>, vector<1x128x32xbf16>,
    return
  }
  func.func @transform_0(%arg0: i32) -> (i32, i32, i32) {
    %c0_i32 = arith.constant 0 : i32
    %c0_i32_0 = arith.constant 0 : i32
    %c0_i32_1 = arith.constant 0 : i32
    return %arg0, %c0_i32, %c0_i32_0 : i32, i32, i32
  }
  func.func @transform_1(%arg0: i32) -> (i32, i32) {
    %c0_i32 = arith.constant 0 : i32
    %c0_i32_0 = arith.constant 0 : i32
    %c0_i32_1 = arith.constant 0 : i32
    return %c0_i32, %c0_i32_0 : i32, i32
  }
  func.func @transform_2(%arg0: i32) -> (i32, i32) {
    %c0_i32 = arith.constant 0 : i32
    %c0_i32_0 = arith.constant 0 : i32
    %c0_i32_1 = arith.constant 0 : i32
    return %c0_i32, %c0_i32_0 : i32, i32
  }
  func.func @transform_3(%arg0: i32) -> (i32, i32, i32) {
    %c0_i32 = arith.constant 0 : i32
    %c0_i32_0 = arith.constant 0 : i32
    %c0_i32_1 = arith.constant 0 : i32
    return %arg0, %c0_i32, %c0_i32_0 : i32, i32, i32
  }
}

</mosaic_0001>

<bundles_post_ra>
// kernel: tpu_custom_call.1
= control target key start
LH: loop header
LB: loop body
LE: loop exit
PB: predicated region body
PF: predicated region fallthrough
CT: control target
= control target key end

     0   :  { %8 = vsyncpa [#allocation3], 0  ;;  %s757_s0 = inlined_call_operand.hbm [shape: bf16[2,8,32], index: 0, kind: input, shape index: {}]   ;;  %s758_s1 = inlined_call_operand.hbm [shape: bf16[32,32], index: 1, kind: input, shape index: {}]   ;;  %s759_s2 = inlined_call_operand.vmem [shape: f32[1,32], index: 2, kind: input, shape index: {}]   ;;  %s760_s3 = inlined_call_operand.vmem [shape: bf16[2,128,32], index: 3, kind: output, shape index: {}]  }
   0x1   :  { %10 = vsyncpa [#allocation3 + $0x1], 0 }
   0x2   :  { %11 = vsyncpa [#allocation5], 0  ;;  %s599_s12 = smov 0   ;;  %s601_s13 = smov 0  }
   0x3   :  { %s603_s14 = smov 0   ;;  %s605_s15 = smov 0  }
   0x4 LB: > { %s618_s16 = sadd.s32 4294967295, %s570_s15   ;;  %p37_p0 = scmp.ne.s32.totalorder %s562_s13, %s558_s12  ;;  %s570_s15 = sphi %s605_s15, %s775_s15   ;;  %s566_s14 = sphi %s603_s14, %s774_s14   ;;  %s562_s13 = sphi %s601_s13, %s773_s13   ;;  %s558_s12 = sphi %s599_s12, %s772_s12  }
   0x5   : > { %p761_p1 = scmp.eq.s32.totalorder %s618_s16, 0  ;;  %p383_p2 = scmp.ge.s32.totalorder %s570_s15, 1 }
   0x6   : > { %p116_p3 = scmp.lt.s32.totalorder %s570_s15, 3  ;;  %s572_s19 = smov [#allocation4]  }
   0x7   : > { %p626_p4 = por %p761_p1, %p37_p0  ;;  %s128_s20 = sshll.u32 %s572_s19, 4  ;;  %s129_s20 = int_to_ptr.vmem [resolvable:$true] %s128_s20 }
   0x8   : > { %p630_p5 = pnand %p383_p2, %p116_p3  ;;  %s643_s22 = sadd.s32 1, %s570_s15  }
   0x9   : > { %s764_s17 = scalar_select %p626_p4, 1, 0 }
   0xa   : > { %s765_s18 = scalar_select %p630_p5, 1, 0 }
   0xb   : > { %p423_p6 = pneg %p630_p5  ;;  %s24_s23 = sadd.s32 1, %s566_s14 }
   0xc   : > { %s21_s24 = ssub.s32 %s570_s15, %s643_s22  ;;  %s474_s27 = scalar_lea.hbm %s758_s1, 256 }
   0xd   : > { %p638_p7 = pnand %p423_p6, %p761_p1  ;;  %p475_p8 = scmp.ne.s32.totalorder %s758_s1, %s474_s27 }
   0xe   : > { %p481_p12 = scmp.lt.u32.totalorder %s474_s27, %s758_s1 }
   0xf   : > { %p476_p9 = pneg %p638_p7 }
  0x11   : > { %p477_p10 = pnand %p476_p9, %p475_p8 }
  0x13   : > { %p478_p11 = pneg %p477_p10 }
  0x15   : > { %p483_p13 = pnand %p481_p12, %p478_p11 }
  0x17   : > { %486 = shalt.err (!%p483_p13)
}
  0x18   : > { %s487_s5 = scalar_lea.vmem %s129_s20, 256  ;;  %p495_p6 = scmp.lt.s32.totalorder %s129_s20, %s129_s20 }
  0x19   : > { %p488_p0 = scmp.ne.s32.totalorder %s129_s20, %s487_s5  ;;  %p496_p1 = scmp.lt.s32.totalorder %s487_s5, %s487_s5 }
  0x1b   : > { %p490_p2 = pnand %p488_p0, %p476_p9  ;;  %p497_p4 = por %p496_p1, %p495_p6 }
  0x1d   : > { %p491_p3 = pneg %p490_p2 }
  0x1f   : > { %p498_p5 = pnand %p497_p4, %p491_p3 }
  0x21   : > { %501 = shalt.err (!%p498_p5)
}
  0x22   : > { %s573_s6 = smov 64   ;;  %s574_s7 = smov 4  }
  0x23   : > { %426 = dma.hbm_to_vmem [thread:$0]  (!%p638_p7), %s758_s1, 256, %s129_s20, [#allocation5], %s573_s6, %s573_s6, %s574_s7  }
  0x24   : > { %p22_p8 = scmp.eq.s32.totalorder %s21_s24, 0  ;;  %p31_p9 = scmp.ne.s32.totalorder %s566_s14, %s562_s13 }
  0x25   : > { %p32_p1 = scmp.eq.s32.totalorder %s570_s15, 0  ;;  %p432_p4 = scmp.lt.s32.totalorder %s570_s15, 2 }
  0x26   : > { %s669_s10 = scalar_select %p22_p8, %s566_s14, %s24_s23  }
  0x27   : > { %p33_p5 = por %p32_p1, %p31_p9  ;;  %s145_s11 = sand.u32 1, %s566_s14  }
  0x28   : > { %s386_s12 = sshll.u32 %s145_s11, 2  ;;  %s387_s19 = sshll.u32 %s570_s15, 6 }
  0x29   : > { %s676_s27 = scalar_lea.hbm %s757_s0, %s387_s19  ;;  %s149_s20 = scalar_lea.vmem [#allocation2], %s386_s12 }
  0x2a   : > { %s156_s21 = sshll.u32 %s149_s20, 4  ;;  %p680_p7 = pnand %p432_p4, %p33_p5  ;;  %s678_s21 = int_to_ptr.vmem [resolvable:$true] %s156_s21 }
  0x2b   : > { %s146_s15 = scalar_lea.sflag [#allocation3], %s145_s11  ;;  %s502_s24 = scalar_lea.hbm %s676_s27, 64 }
  0x2c   : > { %p503_p10 = scmp.ne.s32.totalorder %s676_s27, %s502_s24  ;;  %p504_p11 = pneg %p680_p7 }
  0x2d   : > { %s507_s30 = scalar_lea.hbm %s757_s0, 128  ;;  %p508_p0 = scmp.lt.u32.totalorder %s676_s27, %s757_s0 }
  0x2e   : > { %p505_p12 = pnand %p504_p11, %p503_p10  ;;  %p509_p2 = scmp.lt.u32.totalorder %s507_s30, %s502_s24 }
  0x2f   : > { %p511_p6 = scmp.lt.u32.totalorder %s502_s24, %s676_s27 }
  0x30   : > { %p506_p13 = pneg %p505_p12  ;;  %p510_p3 = por %p509_p2, %p508_p0 }
  0x32   : > { %p512_p8 = por %p511_p6, %p510_p3 }
  0x34   : > { %p513_p9 = pnand %p512_p8, %p506_p13 }
  0x36   : > { %516 = shalt.err (!%p513_p9)
}
  0x37   : > { %s517_s6 = scalar_lea.vmem %s678_s21, 64  ;;  %s575_s7 = smov [#allocation2]  }
  0x38   : > { %p518_p1 = scmp.ne.s32.totalorder %s678_s21, %s517_s6  ;;  %s522_s8 = sshll.u32 %s575_s7, 4  ;;  %s523_s8 = int_to_ptr.vmem [resolvable:$false] %s522_s8 }
  0x39   : > { %s524_s9 = scalar_lea.vmem %s523_s8, 128  ;;  %p525_p10 = scmp.lt.s32.totalorder %s678_s21, %s523_s8 }
  0x3a   : > { %p520_p4 = pnand %p518_p1, %p504_p11  ;;  %p526_p12 = scmp.lt.s32.totalorder %s524_s9, %s517_s6 }
  0x3c   : > { %p521_p5 = pneg %p520_p4  ;;  %p527_p0 = por %p526_p12, %p525_p10 }
  0x3e   : > { %p528_p2 = pnand %p527_p0, %p521_p5 }
  0x40   : > { %531 = shalt.err (!%p528_p2)
}
  0x41   : > { %430 = dma.hbm_to_vmem [thread:$0]  (!%p680_p7), %s676_s27, 64, %s678_s21, %s146_s15  }
  0x42   : > { %p768_p13 = scmp.ne.s32.totalorder %s765_s18, 0 }
  0x43   : > { %s167_s11 = sand.u32 (!%p768_p13), 1, %s562_s13   ;;  %p769_p11 = scmp.ne.s32.totalorder (!%p768_p13), %s764_s17, 0 }
  0x44   : > { %165 = sbr.rel (%p768_p13) target bundleno = 305 (0x131), region = 32  ;;  %s389_s12 = sshll.u32 (!%p768_p13), %s167_s11, 2 }
  0x45   : > { %s168_s19 = scalar_lea.sflag (!%p768_p13), [#allocation3], %s167_s11  ;;  %s171_s25 = scalar_lea.vmem (!%p768_p13), [#allocation2], %s389_s12 }
  0x4b   : > { %549 = dma.done.wait (%p769_p11), %s168_s19, 64  }
  0x4c   : > { %551 = vsyncadd (%p769_p11), %s168_s19, 4294967232  ;;  %p770_p3 = scmp.eq.s32.totalorder %s618_s16, 0 }
  0x4e   : > { %553 = dma.done.wait (%p770_p3), [#allocation5], 256   ;;  %p771_p6 = pmov %p770_p3 }
  0x4f   : > { %v576_v0 = vmov 0.0   ;;  %vm577_vm0 = vmmov 0   ;;  %v472_v1 = vld [vmem:[#allocation4] sm:$0xff]   ;;  %v473_v2 = vld [vmem:[#allocation4 + $0x8] sm:$0xff]   ;;  %v204_v3 = vld [vmem:[%s171_s25] sm:$0xf] }
  0x50   : > { %555 = vsyncadd (%p771_p6), [#allocation5], 4294967040  ;;  %409 = vmatprep.subr.bf16.mxu0 %v576_v0  ;;  %413 = vmatprep.mubr.msk.bf16.mxu0 %vm577_vm0, %v576_v0  ;;  %vm228_vm1 = vcmask 261120   ;;  %p198_p7 = scmp.lt.s32.totalorder %s618_s16, 1  ;;  %v578_v4 = vmov 0.0|0.0   ;;  %vm288_vm2 = vcmask 257024  }
  0x51   : > { %410 = vmatpush3.bf16.msra.mxu0 %v472_v1  ;;  %v399_v5 = vcombine.low %v578_v4, %v578_v4  ;;  %v400_v6 = vcombine.high %v578_v4, %v578_v4  ;;  %v393_v7 = vld [vmem:[%s759_s2] ss:$0 sm:$0xff] }
  0x52   : > { %411 = vmatprep.subr.bf16.mxu0 %v576_v0  ;;  %s777_s16 = smov (!%p198_p7, %s618_s16), 1 }
  0x53   : > { %s403_s17 = sshll.u32 %s777_s16, 6 }
  0x54   : > { %s202_s27 = scalar_lea.vmem %s760_s3, %s403_s17 }
  0x55   : > { %412 = vmatpush3.bf16.msra.mxu0 %v473_v2  ;;  %290 = vst.msk [vmem:[%s202_s27 + $0x4] sm:$0xf] %vm288_vm2, %v578_v4  ;;  %291 = vst.msk [vmem:[%s202_s27 + $0x8] sm:$0xf] %vm288_vm2, %v399_v5 }
  0x56   : > { %292 = vst.msk [vmem:[%s202_s27 + $0xc] sm:$0xf] %vm288_vm2, %v400_v6  ;;  %293 = vst.msk [vmem:[%s202_s27 + $0x10] sm:$0xf] %vm288_vm2, %v399_v5 }
  0x57   : > { %294 = vst.msk [vmem:[%s202_s27 + $0x14] sm:$0xf] %vm288_vm2, %v400_v6  ;;  %295 = vst.msk [vmem:[%s202_s27 + $0x18] sm:$0xf] %vm288_vm2, %v399_v5 }
  0x58   : > { %414 = vmatmul.mubr.msk.bf16.vlgmr.msra.gmra.mrb[0].mxu0 %vm228_vm1, %v204_v3  ;;  %296 = vst.msk [vmem:[%s202_s27 + $0x1c] sm:$0xf] %vm288_vm2, %v400_v6  ;;  %297 = vst.msk [vmem:[%s202_s27 + $0x20] sm:$0xf] %vm288_vm2, %v399_v5 }
  0x59   : > { %298 = vst.msk [vmem:[%s202_s27 + $0x24] sm:$0xf] %vm288_vm2, %v400_v6  ;;  %299 = vst.msk [vmem:[%s202_s27 + $0x28] sm:$0xf] %vm288_vm2, %v399_v5 }
  0x5a   : > { %300 = vst.msk [vmem:[%s202_s27 + $0x2c] sm:$0xf] %vm288_vm2, %v400_v6  ;;  %301 = vst.msk [vmem:[%s202_s27 + $0x30] sm:$0xf] %vm288_vm2, %v399_v5 }
  0x5b   : > { %302 = vst.msk [vmem:[%s202_s27 + $0x34] sm:$0xf] %vm288_vm2, %v400_v6  ;;  %303 = vst.msk [vmem:[%s202_s27 + $0x38] sm:$0xf] %vm288_vm2, %v399_v5 }
  0x5c   : > { %304 = vst.msk [vmem:[%s202_s27 + $0x3c] sm:$0xf] %vm288_vm2, %v400_v6 }
 0x12b   : > { %v266_v8 = vpop.f32.mrb[0].mxu0 }
 0x12c   : > { %v267_v9 = vadd.f32 %v393_v7, %v266_v8  ;;  %v415_v10 = vpop.f32.mrb[1].mxu0 }
 0x12d   : > { %v269_v11 = vpop.f32.mrb[2].mxu0 }
 0x12e   : > { %v404_v12 = vpack.c.bf16 %v267_v9, %v267_v9  ;;  %v416_v13 = vpop.f32.mrb[3].mxu0 }
 0x130   : > { %289 = vst.msk [vmem:[%s202_s27] sm:$0xf] %vm288_vm2, %v404_v12 }
 0x131 PF: > { %p14_p8 = scmp.ge.s32.totalorder %s643_s22, 4   ;;  %s772_s12 = smov %s562_s13 }
 0x132   : > { %s773_s13 = smov %s566_s14  ;;  %s774_s14 = smov %s669_s10 }
 0x133   : > { %s775_s15 = smov %s643_s22  ;;  %16 = sbr.rel (!%p14_p8) target bundleno = 4 (0x4), region = 76 }
 0x13a   :  { %326 = vsyncpa [#allocation3], 1 }
 0x13b   :  { %328 = vsyncpa [#allocation3 + $0x1], 1 }
 0x13c   :  { %329 = vsyncpa [#allocation5], 1 }

</bundles_post_ra>
